<compile_context>
chip_gen: v7x
topology: tpu7x:2x2x1
jax: 0.10.0
libtpu: 0.0.40
codegen_flags: <defaults>
</compile_context>

<pallas_src>
import math
from functools import partial

import jax
import jax.numpy as jnp
from jax import lax
from jax.experimental import pallas as pl
from jax.experimental.pallas import tpu as pltpu

# Make the pure-JAX references use true f32 matmuls so they match the kernels.
jax.config.update("jax_default_matmul_precision", "highest")


def _round_up(x, m):
    return ((x + m - 1) // m) * m


# ----------------------------------------------------------------------------
# Kernel 1: standalone (batched) vector-field evaluation  f(h) = MLP(h)
# Transposed layout: batch on the lane axis, everything lane-dense.
#   z^T = w1^T @ h^T : [I, B] -> tanh -> f^T = w2^T @ z^T : [H*C, B]
# ----------------------------------------------------------------------------
def _ncde_vf_kernel(h_ref, w1t_ref, b1t_ref, w2t_ref, b2t_ref, o_ref,
                    *, cast_dtype):
    h = h_ref[...]
    if cast_dtype is not None:
        # bf16 MXU path: cast the activation in-kernel (VPU) instead of paying
        # an extra HBM cast pass in the wrapper; weights are already bf16.
        h = h.astype(cast_dtype)
    z = jnp.dot(w1t_ref[...], h, preferred_element_type=jnp.float32)
    z = jnp.tanh(z + b1t_ref[...])            # bias + tanh stay f32 (EUP)
    if cast_dtype is not None:
        z = z.astype(cast_dtype)
    out = jnp.dot(w2t_ref[...], z, preferred_element_type=jnp.float32)
    o_ref[...] = (out + b2t_ref[...]).astype(o_ref.dtype)


def ncde_vector_field(h, w1, b1, w2, b2, hidden_dim, control_dim,
                      *, block_cols=1024, use_bf16_matmul=False):
    """Fused MLP vector field: returns f(h) of shape [B, hidden_dim, control_dim]."""
    batch, hd = h.shape
    inter = w1.shape[1]
    out_dim = hidden_dim * control_dim
    out_dtype = h.dtype

    # ---- layout plumbing (wrapper-side transpose/pad only) ------------------
    b_pad0 = _round_up(batch, 128)
    tn = min(_round_up(block_cols, 128), b_pad0)
    # v7x megacore: prefer >=2 grid blocks whenever the batch allows it.
    if b_pad0 >= 2 * 128 and b_pad0 // tn < 2:
        tn = _round_up(max(b_pad0 // 2, 128), 128)
    b_pad = _round_up(b_pad0, tn)
    n_blocks = b_pad // tn

    ht = jnp.pad(h, ((0, b_pad - batch), (0, 0))).T            # [H, Bp]
    w1t = w1.T                                                 # [I, H]
    w2t = w2.T                                                 # [H*C, I]
    b1t = jnp.reshape(b1, (-1, 1)).astype(jnp.float32)         # [I, 1]
    b2t = jnp.reshape(b2, (-1, 1)).astype(jnp.float32)         # [H*C, 1]

    cast_dtype = None
    if use_bf16_matmul:
        cast_dtype = jnp.bfloat16
        w1t = w1t.astype(jnp.bfloat16)                         # tiny -> wrapper cast OK
        w2t = w2t.astype(jnp.bfloat16)

    flops = 2 * b_pad * (hd * inter + inter * out_dim)
    bytes_accessed = int(
        ht.size * ht.dtype.itemsize
        + w1t.size * w1t.dtype.itemsize + b1t.size * 4
        + w2t.size * w2t.dtype.itemsize + b2t.size * 4
        + out_dim * b_pad * jnp.dtype(out_dtype).itemsize)

    out_t = pl.pallas_call(
        partial(_ncde_vf_kernel, cast_dtype=cast_dtype),
        out_shape=jax.ShapeDtypeStruct((out_dim, b_pad), out_dtype),
        grid_spec=pltpu.PrefetchScalarGridSpec(
            num_scalar_prefetch=0,
            grid=(n_blocks,),
            in_specs=[
                pl.BlockSpec((hd, tn), lambda i: (0, i)),       # h^T batch tile
                # Weights/biases: constant block index -> DMA'd once, resident
                # in VMEM across the whole grid.
                pl.BlockSpec(w1t.shape, lambda i: (0, 0)),
                pl.BlockSpec(b1t.shape, lambda i: (0, 0)),
                pl.BlockSpec(w2t.shape, lambda i: (0, 0)),
                pl.BlockSpec(b2t.shape, lambda i: (0, 0)),
            ],
            out_specs=pl.BlockSpec((out_dim, tn), lambda i: (0, i)),
        ),
        compiler_params=pltpu.CompilerParams(
            # Batch tiles are independent -> megacore sharding on v7x.
            dimension_semantics=("parallel",),
        ),
        cost_estimate=pl.CostEstimate(
            flops=flops,
            transcendentals=b_pad * inter,
            bytes_accessed=bytes_accessed,
        ),
    )(ht, w1t, b1t, w2t, b2t)

    out = out_t[:, :batch].T                                    # [B, H*C]
    return out.reshape(batch, hidden_dim, control_dim)


# ----------------------------------------------------------------------------
# Kernel 2: fused Euler NCDE solve  h_{t+1} = h_t + f(h_t) · dX_t
# Single grid point; dX resident in VMEM; unrolled in-kernel loop; h carried
# as a loop value (vregs).  Transposed layout: everything is [*, Bp].
# ----------------------------------------------------------------------------
def _ncde_euler_kernel(h0_ref, dx_ref, w1t_ref, b1t_ref, w2t_ref, b2t_ref,
                       rept_ref, selt_ref, hT_ref, *, num_steps):
    # Hoist everything loop-invariant out of the loop (loaded once).
    w1t = w1t_ref[...]
    b1t = b1t_ref[...]
    w2t = w2t_ref[...]
    b2t = b2t_ref[...]
    rept = rept_ref[...]      # [H*C, C]: replicates dX^T across hidden rows
    selt = selt_ref[...]      # [H, H*C]: sums groups of C rows back onto H

    def step(t, h):
        z = jnp.tanh(jnp.dot(w1t, h, preferred_element_type=jnp.float32) + b1t)
        f = jnp.dot(w2t, z, preferred_element_type=jnp.float32) + b2t   # [H*C, Bp]
        dxt = dx_ref[t]                                                 # [C, Bp]
        # In-kernel 4x repeat of dX across hidden rows (tiny MXU matmul, so no
        # HBM-side tiling and no sublane-unaligned concat/relayout).
        dx_tiled = jnp.dot(rept, dxt, preferred_element_type=jnp.float32)
        # dh^T = sel^T @ (f^T ⊙ dX^T_tiled)  ==  einsum('bhc,bc->bh') transposed
        dh = jnp.dot(selt, f * dx_tiled, preferred_element_type=jnp.float32)
        return h + dh

    hT = lax.fori_loop(0, num_steps, step,
                       h0_ref[...].astype(jnp.float32), unroll=True)
    hT_ref[...] = hT.astype(hT_ref.dtype)


def ncde_euler_solve(h0, dx_steps, w1, b1, w2, b2, hidden_dim, control_dim):
    """Euler-integrate dh = f(h)·dX over all steps inside one pallas_call.

    h0:       [B, hidden_dim]       initial hidden state
    dx_steps: [T, B, control_dim]   per-step control increments dX_t
    returns:  [B, hidden_dim]       state after T Euler steps
    """
    T, batch, cd = dx_steps.shape
    hd = hidden_dim
    out_dim = hidden_dim * control_dim
    inter = w1.shape[1]

    b_pad = _round_up(batch, 128)
    # Padded batch columns carry dX == 0, so dh == 0 there: they never drift.
    h0t = jnp.pad(h0, ((0, b_pad - batch), (0, 0))).T                   # [H, Bp]
    dxt = jnp.transpose(
        jnp.pad(dx_steps, ((0, 0), (0, b_pad - batch), (0, 0))),
        (0, 2, 1))                                                      # [T, C, Bp]
    w1t = w1.T                                                          # [I, H]
    w2t = w2.T                                                          # [H*C, I]
    b1t = jnp.reshape(b1, (-1, 1)).astype(jnp.float32)                  # [I, 1]
    b2t = jnp.reshape(b2, (-1, 1)).astype(jnp.float32)                  # [H*C, 1]
    # rept[h*C+c, c'] = 1 iff c'==c ; selt[h', h*C+c] = 1 iff h'==h.
    rept = jnp.tile(jnp.eye(cd, dtype=jnp.float32), (hd, 1))            # [H*C, C]
    selt = jnp.repeat(jnp.eye(hd, dtype=jnp.float32), cd, axis=0).T     # [H, H*C]

    # TODO(synk): for very large batch * T, tile the batch along a "parallel"
    # grid axis instead of keeping the whole dX block resident.
    flops = 2 * T * b_pad * (hd * inter + inter * out_dim + out_dim * hd)
    bytes_accessed = int((h0t.size + dxt.size + w1t.size + b1t.size
                          + w2t.size + b2t.size + rept.size + selt.size
                          + b_pad * hd) * 4)

    hTt = pl.pallas_call(
        partial(_ncde_euler_kernel, num_steps=T),
        out_shape=jax.ShapeDtypeStruct((hd, b_pad), h0.dtype),
        grid_spec=pltpu.PrefetchScalarGridSpec(
            num_scalar_prefetch=0,
            grid=(1,),                                   # single grid point
            in_specs=[
                pl.BlockSpec((hd, b_pad), lambda i: (0, 0)),         # h0^T
                pl.BlockSpec((T, cd, b_pad), lambda i: (0, 0, 0)),   # dX^T resident
                pl.BlockSpec(w1t.shape, lambda i: (0, 0)),
                pl.BlockSpec(b1t.shape, lambda i: (0, 0)),
                pl.BlockSpec(w2t.shape, lambda i: (0, 0)),
                pl.BlockSpec(b2t.shape, lambda i: (0, 0)),
                pl.BlockSpec(rept.shape, lambda i: (0, 0)),
                pl.BlockSpec(selt.shape, lambda i: (0, 0)),
            ],
            out_specs=pl.BlockSpec((hd, b_pad), lambda i: (0, 0)),
        ),
        compiler_params=pltpu.CompilerParams(
            dimension_semantics=("arbitrary",),
        ),
        cost_estimate=pl.CostEstimate(
            flops=flops,
            transcendentals=T * b_pad * inter,
            bytes_accessed=bytes_accessed,
        ),
    )(h0t, dxt, w1t, b1t, w2t, b2t, rept, selt)

    return hTt[:, :batch].T


# ----------------------------------------------------------------------------
# Parameters & pure-JAX references
# ----------------------------------------------------------------------------
def init_params(key, hidden_dim, control_dim, intermediate_dim=32,
                dtype=jnp.float32):
    """Deterministic xavier_normal_(gain=0.1) weights and zero biases."""
    k1, k2 = jax.random.split(key)

    def xavier_normal(k, fan_in, fan_out, gain):
        std = gain * math.sqrt(2.0 / (fan_in + fan_out))
        return (std * jax.random.normal(k, (fan_in, fan_out))).astype(dtype)

    # PyTorch nn.Linear stores weight as [out, in]; we store the transpose
    # [in, out] so the math h @ W matches (same forward semantics).
    w1 = xavier_normal(k1, hidden_dim, intermediate_dim, gain=0.1)
    b1 = jnp.zeros((1, intermediate_dim), dtype=dtype)
    w2 = xavier_normal(k2, intermediate_dim, hidden_dim * control_dim, gain=0.1)
    b2 = jnp.zeros((1, hidden_dim * control_dim), dtype=dtype)
    return w1, b1, w2, b2


def vf_reference(h, w1, b1, w2, b2, hidden_dim, control_dim):
    z = jnp.tanh(h @ w1 + b1)
    out = z @ w2 + b2
    return out.reshape(h.shape[0], hidden_dim, control_dim)


def euler_reference(h0, dx_steps, w1, b1, w2, b2, hidden_dim, control_dim):
    def step(h, dx):
        f = vf_reference(h, w1, b1, w2, b2, hidden_dim, control_dim)
        return h + jnp.einsum('bhc,bc->bh', f, dx), None
    hT, _ = jax.lax.scan(step, h0, dx_steps)
    return hT


if __name__ == "__main__":
    # Shapes implied by NCDETransformer: d_k = d_v = 4 -> the vector field has
    # hidden_dim = control_dim = 4, intermediate_dim = 32, evaluated on
    # batch * n_head * seq_len = 2 * 2 * 8 = 32 flattened hidden states.
    batch_size, n_head, seq_len = 2, 2, 8
    hidden_dim = control_dim = 4
    intermediate_dim = 32
    n_rows = batch_size * n_head * seq_len        # 32
    n_steps = 16                                  # Euler solver steps

    key = jax.random.PRNGKey(0)
    kh, kp, kx = jax.random.split(key, 3)

    h0 = jax.random.normal(kh, (n_rows, hidden_dim), dtype=jnp.float32)
    w1, b1, w2, b2 = init_params(kp, hidden_dim, control_dim, intermediate_dim)
    # Per-step control increments dX_t (≈ dq/dt * Δt sampled from the query path).
    dx_steps = 0.05 * jax.random.normal(
        kx, (n_steps, n_rows, control_dim), dtype=jnp.float32)

    # 1) Standalone batched, lane-dense (transposed) vector-field evaluation (f32).
    f_out = jax.block_until_ready(
        ncde_vector_field(h0, w1, b1, w2, b2, hidden_dim, control_dim))
    f_ref = vf_reference(h0, w1, b1, w2, b2, hidden_dim, control_dim)
    assert f_out.shape == (n_rows, hidden_dim, control_dim), f_out.shape
    assert jnp.allclose(f_out, f_ref, atol=1e-4, rtol=1e-4), "vf mismatch"

    # 1b) bf16 MXU path (in-kernel activation cast); looser tolerance.
    f_bf16 = jax.block_until_ready(
        ncde_vector_field(h0, w1, b1, w2, b2, hidden_dim, control_dim,
                          use_bf16_matmul=True))
    assert jnp.allclose(f_bf16, f_ref, atol=5e-3, rtol=5e-2), "bf16 vf mismatch"

    # 2) Fused Euler NCDE solve: whole integration in ONE grid point / one call.
    hT = jax.block_until_ready(
        ncde_euler_solve(h0, dx_steps, w1, b1, w2, b2, hidden_dim, control_dim))
    hT_ref = euler_reference(h0, dx_steps, w1, b1, w2, b2,
                             hidden_dim, control_dim)
    assert hT.shape == (n_rows, hidden_dim), hT.shape
    assert jnp.allclose(hT, hT_ref, atol=1e-4, rtol=1e-4), "euler solve mismatch"

    print("KERNEL_OK")
</pallas_src>

<mosaic_0001>
module attributes {stable_mosaic.version = 11 : i64} {
  func.func @_ncde_vf_kernel(%arg0: i32, %arg1: memref<4x128xf32, #tpu.memory_space<vmem>>, %arg2: memref<32x4xf32, #tpu.memory_space<vmem>>, %arg3: memref<32x1xf32, #tpu.memory_space<vmem>>, %arg4: memref<16x32xf32, #tpu.memory_space<vmem>>, %arg5: memref<16x1xf32, #tpu.memory_space<vmem>>, %arg6: memref<16x128xf32, #tpu.memory_space<vmem>>) attributes {dimension_semantics = [#tpu.dimension_semantics<parallel>], iteration_bounds = array<i64: 1>, scalar_prefetch = 0 : i64, scratch_operands = 0 : i64, tpu.core_type = #tpu.core_type<tc>, window_params = [{transform_indices = @transform_0, window_bounds = array<i64: 4, 128>}, {pipeline_mode = #tpu.pipeline_mode<synchronous>, transform_indices = @transform_1, window_bounds = array<i64: 32, 4>}, {pipeline_mode = #tpu.pipeline_mode<synchronous>, transform_indices = @transform_2, window_bounds = array<i64: 32, 1>}, {pipeline_mode = #tpu.pipeline_mode<synchronous>, transform_indices = @transform_3, window_bounds = array<i64: 16, 32>}, {pipeline_mode = #tpu.pipeline_mode<synchronous>, transform_indices = @transform_4, window_bounds = array<i64: 16, 1>}, {transform_indices = @transform_5, window_bounds = array<i64: 16, 128>}]} {
    %c0 = arith.constant 0 : index
    %c0_0 = arith.constant 0 : index
    %0 = vector.load %arg1[%c0, %c0_0] : memref<4x128xf32, #tpu.memory_space<vmem>>, vector<4x128xf32>
    %c0_1 = arith.constant 0 : index
    %c0_2 = arith.constant 0 : index
    %1 = vector.load %arg2[%c0_1, %c0_2] : memref<32x4xf32, #tpu.memory_space<vmem>>, vector<32x4xf32>
    %cst = arith.constant dense<0.000000e+00> : vector<32x128xf32>
    %2 = tpu.matmul %1, %0, %cst {dimension_numbers = #tpu.dot_dimension_numbers<[1], [0], [0], [1], [0, 0, 1, 1], [], []>, precision = #tpu.contract_precision<fp32>} : vector<32x4xf32>, vector<4x128xf32>, vector<32x128xf32> -> vector<32x128xf32>
    %c0_3 = arith.constant 0 : index
    %c0_4 = arith.constant 0 : index
    %3 = vector.load %arg3[%c0_3, %c0_4] : memref<32x1xf32, #tpu.memory_space<vmem>>, vector<32x1xf32>
    %4 = vector.broadcast %3 : vector<32x1xf32> to vector<32x128xf32>
    %5 = arith.addf %2, %4 : vector<32x128xf32>
    %6 = math.tanh %5 : vector<32x128xf32>
    %c0_5 = arith.constant 0 : index
    %c0_6 = arith.constant 0 : index
    %7 = vector.load %arg4[%c0_5, %c0_6] : memref<16x32xf32, #tpu.memory_space<vmem>>, vector<16x32xf32>
    %cst_7 = arith.constant dense<0.000000e+00> : vector<16x128xf32>
    %8 = tpu.matmul %7, %6, %cst_7 {dimension_numbers = #tpu.dot_dimension_numbers<[1], [0], [0], [1], [0, 0, 1, 1], [], []>, precision = #tpu.contract_precision<fp32>} : vector<16x32xf32>, vector<32x128xf32>, vector<16x128xf32> -> vector<16x128xf32>
    %c0_8 = arith.constant 0 : index
    %c0_9 = arith.constant 0 : index
    %9 = vector.load %arg5[%c0_8, %c0_9] : memref<16x1xf32, #tpu.memory_space<vmem>>, vector<16x1xf32>
    %10 = vector.broadcast %9 : vector<16x1xf32> to vector<16x128xf32>
    %11 = arith.addf %8, %10 : vector<16x128xf32>
    %c0_10 = arith.constant 0 : index
    %c0_11 = arith.constant 0 : index
    %12 = vector.load %arg6[%c0_10, %c0_11] : memref<16x128xf32, #tpu.memory_space<vmem>>, vector<16x128xf32>
    tpu.vector_store %arg6[%c0_10, %c0_11], %11 {strides = array<i32>} : memref<16x128xf32, #tpu.memory_space<vmem>>, vector<16x128xf32>,
    return
  }
  func.func @transform_0(%arg0: i32) -> (i32, i32) {
    %c0_i32 = arith.constant 0 : i32
    %c0_i32_0 = arith.constant 0 : i32
    return %c0_i32, %arg0 : i32, i32
  }
  func.func @transform_1(%arg0: i32) -> (i32, i32) {
    %c0_i32 = arith.constant 0 : i32
    %c0_i32_0 = arith.constant 0 : i32
    %c0_i32_1 = arith.constant 0 : i32
    return %c0_i32, %c0_i32_0 : i32, i32
  }
  func.func @transform_2(%arg0: i32) -> (i32, i32) {
    %c0_i32 = arith.constant 0 : i32
    %c0_i32_0 = arith.constant 0 : i32
    %c0_i32_1 = arith.constant 0 : i32
    return %c0_i32, %c0_i32_0 : i32, i32
  }
  func.func @transform_3(%arg0: i32) -> (i32, i32) {
    %c0_i32 = arith.constant 0 : i32
    %c0_i32_0 = arith.constant 0 : i32
    %c0_i32_1 = arith.constant 0 : i32
    return %c0_i32, %c0_i32_0 : i32, i32
  }
  func.func @transform_4(%arg0: i32) -> (i32, i32) {
    %c0_i32 = arith.constant 0 : i32
    %c0_i32_0 = arith.constant 0 : i32
    %c0_i32_1 = arith.constant 0 : i32
    return %c0_i32, %c0_i32_0 : i32, i32
  }
  func.func @transform_5(%arg0: i32) -> (i32, i32) {
    %c0_i32 = arith.constant 0 : i32
    %c0_i32_0 = arith.constant 0 : i32
    return %c0_i32, %arg0 : i32, i32
  }
}

</mosaic_0001>

<bundles_post_ra>
// kernel: tpu_custom_call.1
= control target key start
LH: loop header
LB: loop body
LE: loop exit
PB: predicated region body
PF: predicated region fallthrough
CT: control target
= control target key end

     0   :  { %vm63_vm0 = vcmask 1043456   ;;  %vm50_vm1 = vcmask 31744   ;;  %v1515_v12 = vmov 0   ;;  %s1654_s0 = inlined_call_operand.vmem [shape: f32[4,128], index: 0, kind: input, shape index: {}]   ;;  %s1655_s1 = inlined_call_operand.vmem [shape: f32[32,4], index: 1, kind: input, shape index: {}]   ;;  %s1656_s2 = inlined_call_operand.vmem [shape: f32[32,1], index: 2, kind: input, shape index: {}]   ;;  %s1657_s3 = inlined_call_operand.vmem [shape: f32[16,32], index: 3, kind: input, shape index: {}]   ;;  %s1658_s4 = inlined_call_operand.vmem [shape: f32[16,1], index: 4, kind: input, shape index: {}]   ;;  %s1659_s5 = inlined_call_operand.hbm [shape: f32[16,128], index: 5, kind: output, shape index: {}]  }
   0x1   :  { %v21_v0 = vld [vmem:[%s1654_s0] sm:$0xf]  ;;  %v23_v2 = vld [vmem:[%s1655_s1 + $0x8] sm:$0xff]  ;;  %v24_v6 = vld [vmem:[%s1655_s1 + $0x10] sm:$0xff]  ;;  %1481 = vset.pattern.permute.xlu0 %v1515_v12  ;;  %1482 = vset.pattern.permute.xlu1 %v1515_v12 }
   0x2   :  { %v22_v1 = vld [vmem:[%s1655_s1] sm:$0xff]  ;;  %v65_v3 = vsel %vm63_vm0, %v21_v0, 0  ;;  %v55_v5 = vsel %vm50_vm1, %v23_v2, 0  ;;  %v25_v7 = vld [vmem:[%s1655_s1 + $0x18] sm:$0xff]  ;;  %v58_v11 = vsel %vm50_vm1, %v24_v6, 0  ;;  %v28_v14 = vld [vmem:[%s1656_s2 + $0x10] sm:$0xff] }
   0x3   :  { %v52_v4 = vsel %vm50_vm1, %v22_v1, 0  ;;  %v1566_v8 = vand.u32 4294901760, %v65_v3  ;;  %v1570_v10 = vand.u32 4294901760, %v55_v5  ;;  %v26_v13 = vld [vmem:[%s1656_s2] sm:$0xff]  ;;  %v1579_v15 = vand.u32 4294901760, %v58_v11  ;;  %42 = vperm.xlu1 %1482, %v28_v14   ;;  %v27_v21 = vld [vmem:[%s1656_s2 + $0x8] sm:$0xff] }
   0x4   :  { %v1568_v9 = vand.u32 4294901760, %v52_v4  ;;  %v61_v16 = vsel %vm50_vm1, %v25_v7, 0  ;;  %32 = vperm.xlu0 %1481, %v26_v13   ;;  %v29_v22 = vld [vmem:[%s1656_s2 + $0x18] sm:$0xff] }
   0x5   :  { %1279 = vmatprep.subr.mxu0 %v1566_v8  ;;  %v144_v18 = vsub.f32 %v55_v5, %v1570_v10  ;;  %v175_v19 = vsub.f32 %v65_v3, %v1566_v8  ;;  %v163_v20 = vand.u32 4294901760, %v61_v16 }
   0x6   :  { %v134_v17 = vsub.f32 %v52_v4, %v1568_v9 }
   0x7   :  { %10 = vsyncpa [#allocation3], 0  ;;  %1280 = vmatpush3.msra.mxu0 %v1566_v8  ;;  %v154_v23 = vsub.f32 %v58_v11, %v1579_v15  ;;  %v145_v25 = vand.u32 4294901760, %v144_v18  ;;  %v176_v26 = vand.u32 4294901760, %v175_v19  ;;  %v164_v27 = vsub.f32 %v61_v16, %v163_v20  ;;  %47 = vperm.xlu1 %1482, %v29_v22   ;;  %v648_v33 = vld [vmem:[%s1658_s4] sm:$0xff]  ;;  %v649_v34 = vld [vmem:[%s1658_s4 + $0x8] sm:$0xff] }
   0x8   :  { %v135_v24 = vand.u32 4294901760, %v134_v17  ;;  %37 = vperm.xlu0 %1481, %v27_v21   ;;  %v646_v42 = vld [vmem:[%s1657_s3] sm:$0xff]  ;;  %vm660_vm2 = vcmask 261120   ;;  %v647_v55 = vld [vmem:[%s1657_s3 + $0x8] sm:$0xff]  ;;  %s1516_s3 = smov [#allocation2]  }
   0x9   :  { %v155_v28 = vand.u32 4294901760, %v154_v23  ;;  %v146_v30 = vsub.f32 %v144_v18, %v145_v25  ;;  %v177_v31 = vsub.f32 %v175_v19, %v176_v26  ;;  %v165_v32 = vand.u32 4294901760, %v164_v27  ;;  %s1202_s15 = sshll.u32 %s1516_s3, 4  ;;  %s1203_s15 = int_to_ptr.vmem [resolvable:$true] %s1202_s15 }
   0xa   :  { %v136_v29 = vsub.f32 %v134_v17, %v135_v24  ;;  %v662_v43 = vsel %vm660_vm2, %v646_v42, 0  ;;  %v665_v59 = vsel %vm660_vm2, %v647_v55, 0  ;;  %s1491_s16 = scalar_lea.vmem %s1203_s15, 256  ;;  %p1496_p1 = scmp.lt.s32.totalorder %s1203_s15, %s1203_s15 }
   0xb   :  { %v156_v35 = vsub.f32 %v154_v23, %v155_v28  ;;  %v147_v37 = vand.u32 4294901760, %v146_v30  ;;  %v178_v38 = vand.u32 4294901760, %v177_v31  ;;  %v166_v39 = vsub.f32 %v164_v27, %v165_v32  ;;  %657 = vperm.xlu1 %1482, %v649_v34   ;;  %p1492_p0 = scmp.ne.s32.totalorder %s1203_s15, %s1491_s16  ;;  %p1497_p2 = scmp.lt.s32.totalorder %s1491_s16, %s1491_s16 }
   0xc   :  { %v137_v36 = vand.u32 4294901760, %v136_v29  ;;  %652 = vperm.xlu0 %1481, %v648_v33   ;;  %v1617_v44 = vand.u32 4294901760, %v662_v43  ;;  %v1630_v63 = vand.u32 4294901760, %v665_v59 }
   0xd   :  { %v157_v40 = vand.u32 4294901760, %v156_v35  ;;  %1287 = vmatprep.subr.mxu0 %v178_v38  ;;  %v167_v41 = vand.u32 4294901760, %v166_v39  ;;  %p1498_p3 = por %p1497_p2, %p1496_p1 }
   0xe   :  { %1281 = vmatprep.mubr.f32.mxu0 %v137_v36  ;;  %v1620_v45 = vsub.f32 %v662_v43, %v1617_v44  ;;  %v747_v0 = vsub.f32 %v665_v59, %v1630_v63 }
   0xf   :  { %1282 = vmatmul.mubr.f32.vlgmr.msra.gmra.mrb[0].mxu0 %v147_v37  ;;  %p1499_p4 = pnand %p1498_p3, %p1492_p0 }
  0x10   :  { %1288 = vmatpush3.msra.mxu0 %v178_v38  ;;  %1284 = vmatprep.mubr.f32.mxu0 %v157_v40  ;;  %v738_v46 = vand.u32 4294901760, %v1620_v45  ;;  %v748_v5 = vand.u32 4294901760, %v747_v0 }
  0x11   :  { %1295 = vmatprep.subr.mxu0 %v175_v19 }
  0x12   :  { %v739_v47 = vsub.f32 %v1620_v45, %v738_v46  ;;  %v749_v14 = vsub.f32 %v747_v0, %v748_v5 }
  0x13   :  { %1285 = vmatmul.mubr.f32.gmra.mrb[2].mxu0 %v167_v41 }
  0x14   :  { %1289 = vmatprep.mubr.f32.mxu0 %v1568_v9  ;;  %v740_v48 = vand.u32 4294901760, %v739_v47 }
  0x16   :  { %1335 = vmatprep.mubr.f32.mxu1 %v740_v48 }
  0x17   :  { %1290 = vmatmul.mubr.f32.vlgmr.msra.gmra.mrb[0].mxu0 %v1570_v10 }
  0x18   :  { %1296 = vmatpush3.msra.mxu0 %v175_v19  ;;  %1292 = vmatprep.mubr.f32.mxu0 %v1579_v15 }
  0x19   :  { %1303 = vmatprep.subr.mxu0 %v1566_v8 }
  0x1b   :  { %1293 = vmatmul.mubr.f32.gmra.mrb[2].mxu0 %v163_v20 }
  0x1c   :  { %1297 = vmatprep.mubr.f32.mxu0 %v134_v17 }
  0x1f   :  { %1298 = vmatmul.mubr.f32.vlgmr.msra.gmra.mrb[0].mxu0 %v144_v18 }
  0x20   :  { %1304 = vmatpush3.msra.mxu0 %v1566_v8  ;;  %1300 = vmatprep.mubr.f32.mxu0 %v154_v23 }
  0x21   :  { %1311 = vmatprep.subr.mxu0 %v176_v26 }
  0x23   :  { %1301 = vmatmul.mubr.f32.gmra.mrb[2].mxu0 %v164_v27 }
  0x24   :  { %1305 = vmatprep.mubr.f32.mxu0 %v135_v24 }
  0x27   :  { %1306 = vmatmul.mubr.f32.vlgmr.msra.gmra.mrb[0].mxu0 %v145_v25  ;;  %v750_v25 = vand.u32 4294901760, %v749_v14 }
  0x28   :  { %1312 = vmatpush3.msra.mxu0 %v176_v26  ;;  %1308 = vmatprep.mubr.f32.mxu0 %v155_v28 }
  0x29   :  { %1319 = vmatprep.subr.mxu0 %v1566_v8 }
  0x2b   :  { %1309 = vmatmul.mubr.f32.gmra.mrb[2].mxu0 %v165_v32 }
  0x2c   :  { %1313 = vmatprep.mubr.f32.mxu0 %v1568_v9 }
  0x2f   :  { %1314 = vmatmul.mubr.f32.vlgmr.msra.gmra.mrb[0].mxu0 %v1570_v10 }
  0x30   :  { %1320 = vmatpush3.msra.mxu0 %v1566_v8  ;;  %1316 = vmatprep.mubr.f32.mxu0 %v1579_v15 }
  0x33   :  { %1317 = vmatmul.mubr.f32.gmra.mrb[2].mxu0 %v163_v20 }
  0x34   :  { %1321 = vmatprep.mubr.f32.mxu0 %v1568_v9 }
  0x37   :  { %1322 = vmatmul.mubr.f32.vlgmr.msra.gmra.mrb[0].mxu0 %v1570_v10 }
  0x38   :  { %1324 = vmatprep.mubr.f32.mxu0 %v1579_v15 }
  0x3b   :  { %1325 = vmatmul.mubr.f32.gmra.mrb[2].mxu0 %v163_v20 }
  0x82   :  { %v43_v50 = vpop.permute.xlu1 %42 }
  0x83   :  { %v33_v49 = vpop.permute.xlu0 %32 }
  0x86   :  { %v48_v57 = vpop.permute.xlu1 %47 }
  0x87   :  { %v38_v51 = vpop.permute.xlu0 %37 }
  0x8a   :  { %v658_v36 = vpop.permute.xlu1 %657 }
  0x8b   :  { %v653_v38 = vpop.permute.xlu0 %652 }
 0x10a   :  { %v1323_v52 = vpop.f32.mrb[0].mxu0 }
 0x10b   :  { %v1441_v53 = vadd.f32 %v1323_v52, %v38_v51  ;;  %v620_v54 = vpop.f32.mrb[1].mxu0 }
 0x10c   :  { %v1442_v56 = vadd.f32 %v620_v54, %v33_v49 }
 0x10d   :  { %1483 = vtanh.f32 %v1441_v53 }
 0x10e   :  { %1485 = vtanh.f32 %v1442_v56  ;;  %v1326_v58 = vpop.f32.mrb[2].mxu0 }
 0x10f   :  { %v1443_v60 = vadd.f32 %v1326_v58, %v48_v57  ;;  %v632_v61 = vpop.f32.mrb[3].mxu0 }
 0x110   :  { %v1444_v62 = vadd.f32 %v632_v61, %v43_v50 }
 0x111   :  { %1487 = vtanh.f32 %v1443_v60 }
 0x112   :  { %1489 = vtanh.f32 %v1444_v62 }
 0x117   :  { %v1484_v1 = vpop.eup %1483 }
 0x118   :  { %v1486_v2 = vpop.eup %1485  ;;  %v671_v3 = vand.u32 4294901760, %v1484_v1 }
 0x119   :  { %v668_v4 = vand.u32 4294901760, %v1486_v2 }
 0x11a   :  { %v765_v6 = vsub.f32 %v1484_v1, %v671_v3 }
 0x11b   :  { %v1488_v7 = vpop.eup %1487  ;;  %v1393_v8 = vpack.c.bf16 %v671_v3, %v668_v4  ;;  %v758_v9 = vsub.f32 %v1486_v2, %v668_v4 }
 0x11c   :  { %v1490_v10 = vpop.eup %1489  ;;  %v677_v11 = vand.u32 4294901760, %v1488_v7  ;;  %v766_v12 = vand.u32 4294901760, %v765_v6 }
 0x11d   :  { %v674_v13 = vand.u32 4294901760, %v1490_v10  ;;  %1394 = vmatprep.subr.bf16.mxu1 %v1393_v8  ;;  %v759_v15 = vand.u32 4294901760, %v758_v9  ;;  %v1409_v16 = vpack.c.bf16 %v765_v6, %v758_v9 }
 0x11e   :  { %1396 = vmatpush3.bf16.msra.mxu1 %v1393_v8  ;;  %v767_v17 = vsub.f32 %v765_v6, %v766_v12  ;;  %v779_v18 = vsub.f32 %v1488_v7, %v677_v11 }
 0x11f   :  { %v1397_v19 = vpack.c.bf16 %v677_v11, %v674_v13  ;;  %v760_v20 = vsub.f32 %v758_v9, %v759_v15  ;;  %v772_v21 = vsub.f32 %v1490_v10, %v674_v13  ;;  %v1425_v22 = vpack.c.bf16 %v766_v12, %v759_v15 }
 0x120   :  { %v768_v23 = vand.u32 4294901760, %v767_v17  ;;  %v780_v24 = vand.u32 4294901760, %v779_v18 }
 0x121   :  { %1398 = vmatprep.subr.bf16.mxu1 %v1397_v19  ;;  %v761_v26 = vand.u32 4294901760, %v760_v20  ;;  %v773_v27 = vand.u32 4294901760, %v772_v21  ;;  %v1413_v28 = vpack.c.bf16 %v779_v18, %v772_v21 }
 0x122   :  { %1400 = vmatpush3.bf16.msra.mxu1 %v1397_v19  ;;  %v781_v29 = vsub.f32 %v779_v18, %v780_v24 }
 0x123   :  { %v1401_v30 = vpack.c.bf16 %v768_v23, %v761_v26  ;;  %v774_v31 = vsub.f32 %v772_v21, %v773_v27  ;;  %v1429_v32 = vpack.c.bf16 %v780_v24, %v773_v27 }
 0x124   :  { %v782_v33 = vand.u32 4294901760, %v781_v29 }
 0x125   :  { %1336 = vmatmul.mubr.f32.vlgmr.msra.gmra.mrb[0].mxu1 %v750_v25  ;;  %1402 = vmatprep.subr.bf16.mxu1 %v1401_v30  ;;  %v775_v34 = vand.u32 4294901760, %v774_v31 }
 0x126   :  { %1404 = vmatpush3.bf16.msra.mxu1 %v1401_v30  ;;  %1346 = vmatprep.mubr.f32.mxu1 %v1617_v44 }
 0x127   :  { %v1405_v35 = vpack.c.bf16 %v782_v33, %v775_v34 }
 0x129   :  { %1406 = vmatprep.subr.bf16.mxu1 %v1405_v35 }
 0x12a   :  { %1408 = vmatpush3.bf16.msra.mxu1 %v1405_v35 }
 0x12b   :  { %1410 = vmatprep.subr.bf16.mxu1 %v1409_v16 }
 0x12d   :  { %1347 = vmatmul.mubr.f32.vlgmr.msra.gmra.mrb[0].mxu1 %v1630_v63 }
 0x12e   :  { %1412 = vmatpush3.bf16.msra.mxu1 %v1409_v16  ;;  %1357 = vmatprep.mubr.f32.mxu1 %v1620_v45 }
 0x12f   :  { %1414 = vmatprep.subr.bf16.mxu1 %v1413_v28 }
 0x132   :  { %1416 = vmatpush3.bf16.msra.mxu1 %v1413_v28 }
 0x133   :  { %1418 = vmatprep.subr.bf16.mxu1 %v1393_v8 }
 0x135   :  { %1358 = vmatmul.mubr.f32.vlgmr.msra.gmra.mrb[0].mxu1 %v747_v0 }
 0x136   :  { %1420 = vmatpush3.bf16.msra.mxu1 %v1393_v8  ;;  %1368 = vmatprep.mubr.f32.mxu1 %v738_v46 }
 0x137   :  { %1422 = vmatprep.subr.bf16.mxu1 %v1397_v19 }
 0x13a   :  { %1424 = vmatpush3.bf16.msra.mxu1 %v1397_v19 }
 0x13b   :  { %1426 = vmatprep.subr.bf16.mxu1 %v1425_v22 }
 0x13d   :  { %1369 = vmatmul.mubr.f32.vlgmr.msra.gmra.mrb[0].mxu1 %v748_v5 }
 0x13e   :  { %1428 = vmatpush3.bf16.msra.mxu1 %v1425_v22  ;;  %1379 = vmatprep.mubr.f32.mxu1 %v1617_v44 }
 0x13f   :  { %1430 = vmatprep.subr.bf16.mxu1 %v1429_v32 }
 0x142   :  { %1432 = vmatpush3.bf16.msra.mxu1 %v1429_v32 }
 0x143   :  { %1434 = vmatprep.subr.bf16.mxu1 %v1393_v8 }
 0x145   :  { %1380 = vmatmul.mubr.f32.vlgmr.msra.gmra.mrb[0].mxu1 %v1630_v63 }
 0x146   :  { %1436 = vmatpush3.bf16.msra.mxu1 %v1393_v8  ;;  %1390 = vmatprep.mubr.f32.mxu1 %v1617_v44 }
 0x147   :  { %1438 = vmatprep.subr.bf16.mxu1 %v1397_v19 }
 0x14a   :  { %1440 = vmatpush3.bf16.msra.mxu1 %v1397_v19 }
 0x14d   :  { %1391 = vmatmul.mubr.f32.vlgmr.msra.gmra.mrb[0].mxu1 %v1630_v63 }
 0x220   :  { %v1392_v37 = vpop.f32.mrb[0].mxu1 }
 0x221   :  { %v1445_v39 = vadd.f32 %v1392_v37, %v658_v36  ;;  %v1185_v40 = vpop.f32.mrb[1].mxu1 }
 0x222   :  { %v1446_v41 = vadd.f32 %v1185_v40, %v653_v38 }
 0x223   :  { %1196 = vst [vmem:[#allocation2 + $0x8] sm:$0xff] %v1445_v39 }
 0x224   :  { %1195 = vst [vmem:[#allocation2] sm:$0xff] %v1446_v41 }
 0x225   :  { %1502 = shalt.err (!%p1499_p4)
}
 0x226   :  { %s1503_s19 = scalar_lea.hbm %s1659_s5, 256 }
 0x227   :  { %p1504_p5 = scmp.ne.s32.totalorder %s1659_s5, %s1503_s19  ;;  %p1507_p6 = scmp.lt.u32.totalorder %s1503_s19, %s1659_s5 }
 0x229   :  { %p1509_p7 = pnand %p1507_p6, %p1504_p5 }
 0x22b   :  { %1512 = shalt.err (!%p1509_p7)
}
 0x22c   :  { %s1517_s24 = smov 128   ;;  %s1518_s25 = smov 8  }
 0x22d   :  { %1208 = dma.vmem_to_hbm [thread:$0]  %s1203_s15, 256, %s1659_s5, [#allocation3], %s1517_s24, %s1517_s24, %s1518_s25  }
 0x22e   :  { %1513 = dma.done.wait [#allocation3], 256  }
 0x22f   :  { %1514 = vsyncadd [#allocation3], 4294967040 }
 0x230   :  { %1212 = vsyncpa [#allocation3], 1 }

</bundles_post_ra>
